<compile_context>
chip_gen: v7x
topology: tpu7x:2x2x1
jax: 0.10.0
libtpu: 0.0.40
codegen_flags: <defaults>
</compile_context>

<pallas_src>
import math

import jax
import jax.numpy as jnp
from jax.experimental import pallas as pl
from jax.experimental.pallas import tpu as pltpu


def _round_up(n, m):
    return ((n + m - 1) // m) * m


def _make_mlp_kernel(num_linear_layers):
    """Fused MLP kernel.

    Ref order: x_t, (W_0, b_0), ..., (W_{L-1}, b_{L-1}), out.
      x_t            : (input_dim, TB)  bf16   (batch on lanes)
      W_i (i < L-1)  : (out_i, in_i)    bf16
      b_i (i < L-1)  : (out_i, 1)       f32
      W_{L-1}        : (hidden, 1)      f32    (VPU mul + sublane reduce)
      b_{L-1}        : (1, 1)           f32
      out            : (1, TB)
    ReLU after every hidden layer; sigmoid on the final output.
    """

    def kernel(*refs):
        x_ref = refs[0]
        o_ref = refs[-1]

        h = x_ref[...]  # (input_dim, TB) bf16
        # Hidden layers: MXU matmul (bf16 in, f32 accumulate) + f32 bias/ReLU,
        # then straight back to bf16 so the live (hidden, TB) activation stays
        # half-size (doubles the TB we can afford before vreg spills).
        for i in range(num_linear_layers - 1):
            w_ref = refs[1 + 2 * i]  # (out, in) bf16
            b_ref = refs[2 + 2 * i]  # (out, 1)  f32
            z = jnp.dot(w_ref[...], h, preferred_element_type=jnp.float32)
            z = z + b_ref[...]
            h = jnp.maximum(z, 0.0).astype(jnp.bfloat16)

        # Output layer (hidden -> 1): single f32 cast, VPU multiply + sublane
        # (XLU) reduction -> lane-dense (1, TB) logits.
        w_ref = refs[1 + 2 * (num_linear_layers - 1)]  # (hidden, 1) f32
        b_ref = refs[2 + 2 * (num_linear_layers - 1)]  # (1, 1)      f32
        h32 = h.astype(jnp.float32)
        logits = jnp.sum(h32 * w_ref[...], axis=0, keepdims=True) + b_ref[...]
        o_ref[...] = jax.nn.sigmoid(logits).astype(o_ref.dtype)

    return kernel


def _prepare_params(params):
    """Convert (in, out)/(1, out) params into the kernel's layout.

    Hidden layers: W -> (out, in) bf16, b -> (out, 1) f32.
    Output layer : W -> (hidden, 1) f32, b -> (1, 1) f32.
    """
    n = len(params)
    flat = []
    for i, (w, b) in enumerate(params):
        if i < n - 1:
            flat.append(jnp.asarray(w.T, dtype=jnp.bfloat16))               # (out, in)
            flat.append(jnp.asarray(b.reshape(-1, 1), dtype=jnp.float32))   # (out, 1)
        else:
            flat.append(jnp.asarray(w, dtype=jnp.float32))                  # (hidden, 1)
            flat.append(jnp.asarray(b.reshape(1, 1), dtype=jnp.float32))    # (1, 1)
    return flat


def _estimate_vmem_bytes(input_dim, hidden_size, n_linear, tb):
    """Per-step VMEM footprint estimate (Pallas double-buffers every block)."""

    def blk(rows, cols, itemsize, nbuf=2):
        return (_round_up(max(rows, 1), 8)
                * _round_up(max(cols, 1), 128) * itemsize * nbuf)

    total = blk(input_dim, tb, 2)                 # x tile (bf16)
    total += blk(1, tb, 4)                        # output tile (f32)
    hidden_in_dims = [input_dim] + [hidden_size] * max(n_linear - 2, 0)
    for d_in in hidden_in_dims:
        total += blk(hidden_size, d_in, 2)        # hidden W (bf16)
        total += blk(hidden_size, 1, 4)           # hidden b (f32)
    total += blk(hidden_size, 1, 4)               # output W (f32)
    total += blk(1, 1, 4)                         # output b (f32)
    # In-kernel activation scratch: f32 pre-activation + bf16 activation.
    total += _round_up(hidden_size, 8) * _round_up(tb, 128) * (4 + 2)
    return total


def mlp_forward(x, params, *, block_batch=4096, out_dtype=jnp.float32):
    """Run the fused MLP Pallas kernel.

    x: (B, input_dim) float32
    params: list of (W, b) with W: (in, out), b: (1, out); last pair maps
            hidden -> 1.  Matches PyTorch nn.Linear with W = W_pt.T.
    out_dtype: set to jnp.bfloat16 to shave output HBM bytes (v5e).
    """
    B, input_dim = x.shape
    n_linear = len(params)
    hidden_size = params[0][0].shape[1]

    # ---- batch tile selection -------------------------------------------
    # As large as block_batch allows (per-step overhead dominates here), but
    #  * keep >= 2 grid steps when the batch spans more than one 128-lane
    #    tile so v7x's two TensorCores both get work ("parallel" axis),
    #  * shrink if the per-step VMEM estimate would blow the v7x budget.
    b_128 = _round_up(max(B, 1), 128)
    tb = min(_round_up(block_batch, 128), b_128)
    if b_128 > 128:
        tb = min(tb, _round_up(-(-b_128 // 2), 128))
    vmem_budget = 48 * 1024 * 1024  # headroom within v7x's 64 MiB VMEM
    while tb > 128 and _estimate_vmem_bytes(input_dim, hidden_size,
                                            n_linear, tb) > vmem_budget:
        tb = max(128, _round_up(tb // 2, 128))

    b_pad = _round_up(B, tb)
    num_steps = b_pad // tb
    grid = (num_steps,)

    # ---- fused pad + transpose + bf16 cast of the input (single pass) ----
    # Padding lanes are zeros; they flow through the net and are sliced off.
    x_t = jnp.pad(x.astype(jnp.bfloat16).T, ((0, 0), (0, b_pad - B)))

    flat_params = _prepare_params(params)
    kernel = _make_mlp_kernel(n_linear)

    # x tiled over the batch grid; weights/biases VMEM-resident (constant
    # index_map).  Deeper input buffering only pays at small tiles / long grids.
    x_spec_kwargs = {}
    if tb <= 1024 and num_steps >= 4:
        x_spec_kwargs["pipeline_mode"] = pl.Buffered(3)
    in_specs = [pl.BlockSpec((input_dim, tb), lambda i: (0, i), **x_spec_kwargs)]
    for arr in flat_params:
        in_specs.append(pl.BlockSpec(arr.shape, lambda i: (0, 0)))

    vmem_limit = int(min(
        max(2 * _estimate_vmem_bytes(input_dim, hidden_size, n_linear, tb),
            16 * 1024 * 1024),
        64 * 1024 * 1024))

    out = pl.pallas_call(
        kernel,
        out_shape=jax.ShapeDtypeStruct((1, b_pad), out_dtype),
        grid=grid,
        in_specs=in_specs,
        out_specs=pl.BlockSpec((1, tb), lambda i: (0, i)),
        compiler_params=pltpu.CompilerParams(
            dimension_semantics=("parallel",),   # megacore-shard batch on v7x
            vmem_limit_bytes=vmem_limit,
        ),
    )(x_t, *flat_params)

    return out[0, :B].astype(jnp.float32).reshape(B, 1)


def init_mlp_params(key, input_dim, hidden_size, num_layers):
    """Deterministic init mirroring nn.Linear default (uniform +/- 1/sqrt(fan_in)).

    Returns list of (W, b); W is (in, out) (PyTorch weight transposed).
    """
    dims = [input_dim] + [hidden_size] * num_layers + [1]
    params = []
    for i in range(len(dims) - 1):
        fan_in, fan_out = dims[i], dims[i + 1]
        key, kw, kb = jax.random.split(key, 3)
        bound = 1.0 / math.sqrt(fan_in)
        w = jax.random.uniform(
            kw, (fan_in, fan_out), jnp.float32, minval=-bound, maxval=bound)
        b = jax.random.uniform(
            kb, (1, fan_out), jnp.float32, minval=-bound, maxval=bound)
        params.append((w, b))
    return params


def mlp_reference(x, params):
    """Pure-JAX f32 reference of the same forward pass."""
    h = x
    n = len(params)
    for i, (w, b) in enumerate(params):
        h = h @ w + b
        if i < n - 1:
            h = jnp.maximum(h, 0.0)
    return jax.nn.sigmoid(h)


if __name__ == "__main__":
    key = jax.random.PRNGKey(0)

    # Shapes consistent with MLP(hidden_size=32, num_layers=2, input_dim=4).
    batch = 8
    input_dim = 4
    hidden_size = 32
    num_layers = 2

    key, kx = jax.random.split(key)
    x = jax.random.normal(kx, (batch, input_dim), jnp.float32)
    params = init_mlp_params(key, input_dim, hidden_size, num_layers)

    out = jax.block_until_ready(mlp_forward(x, params))
    ref = mlp_reference(x, params)
    assert out.shape == (batch, 1), out.shape
    # bf16 MXU inputs / activations -> looser tolerance than pure-f32.
    assert jnp.allclose(out, ref, atol=2e-2, rtol=2e-2), (
        "Pallas output mismatch vs reference (small batch)")

    # Second check: non-tile-aligned batch exercising zero-padding and a
    # multi-step "parallel" grid (>= 2 steps -> both v7x TensorCores).
    key, kx2 = jax.random.split(key)
    x2 = jax.random.normal(kx2, (300, input_dim), jnp.float32)
    out2 = jax.block_until_ready(mlp_forward(x2, params))
    ref2 = mlp_reference(x2, params)
    assert out2.shape == (300, 1), out2.shape
    assert jnp.allclose(out2, ref2, atol=2e-2, rtol=2e-2), (
        "Pallas output mismatch vs reference (B=300)")

    print("KERNEL_OK")
</pallas_src>

<mosaic_0001>
module attributes {stable_mosaic.version = 11 : i64} {
  func.func @kernel(%arg0: i32, %arg1: memref<4x128xbf16, #tpu.memory_space<vmem>>, %arg2: memref<32x4xbf16, #tpu.memory_space<vmem>>, %arg3: memref<32x1xf32, #tpu.memory_space<vmem>>, %arg4: memref<32x32xbf16, #tpu.memory_space<vmem>>, %arg5: memref<32x1xf32, #tpu.memory_space<vmem>>, %arg6: memref<32x1xf32, #tpu.memory_space<vmem>>, %arg7: memref<1x1xf32, #tpu.memory_space<vmem>>, %arg8: memref<1x128xf32, #tpu.memory_space<vmem>>) attributes {dimension_semantics = [#tpu.dimension_semantics<parallel>], iteration_bounds = array<i64: 1>, scalar_prefetch = 0 : i64, scratch_operands = 0 : i64, tpu.core_type = #tpu.core_type<tc>, window_params = [{transform_indices = @transform_0, window_bounds = array<i64: 4, 128>}, {pipeline_mode = #tpu.pipeline_mode<synchronous>, transform_indices = @transform_1, window_bounds = array<i64: 32, 4>}, {pipeline_mode = #tpu.pipeline_mode<synchronous>, transform_indices = @transform_2, window_bounds = array<i64: 32, 1>}, {pipeline_mode = #tpu.pipeline_mode<synchronous>, transform_indices = @transform_3, window_bounds = array<i64: 32, 32>}, {pipeline_mode = #tpu.pipeline_mode<synchronous>, transform_indices = @transform_4, window_bounds = array<i64: 32, 1>}, {pipeline_mode = #tpu.pipeline_mode<synchronous>, transform_indices = @transform_5, window_bounds = array<i64: 32, 1>}, {pipeline_mode = #tpu.pipeline_mode<synchronous>, transform_indices = @transform_6, window_bounds = array<i64: 1, 1>}, {transform_indices = @transform_7, window_bounds = array<i64: 1, 128>}]} {
    %c0 = arith.constant 0 : index
    %c0_0 = arith.constant 0 : index
    %0 = vector.load %arg1[%c0, %c0_0] : memref<4x128xbf16, #tpu.memory_space<vmem>>, vector<4x128xbf16>
    %c0_1 = arith.constant 0 : index
    %c0_2 = arith.constant 0 : index
    %1 = vector.load %arg2[%c0_1, %c0_2] : memref<32x4xbf16, #tpu.memory_space<vmem>>, vector<32x4xbf16>
    %cst = arith.constant dense<0.000000e+00> : vector<32x128xf32>
    %2 = tpu.matmul %1, %0, %cst {dimension_numbers = #tpu.dot_dimension_numbers<[1], [0], [0], [1], [0, 0, 1, 1], [], []>} : vector<32x4xbf16>, vector<4x128xbf16>, vector<32x128xf32> -> vector<32x128xf32>
    %c0_3 = arith.constant 0 : index
    %c0_4 = arith.constant 0 : index
    %3 = vector.load %arg3[%c0_3, %c0_4] : memref<32x1xf32, #tpu.memory_space<vmem>>, vector<32x1xf32>
    %4 = vector.broadcast %3 : vector<32x1xf32> to vector<32x128xf32>
    %5 = arith.addf %2, %4 : vector<32x128xf32>
    %cst_5 = arith.constant 0.000000e+00 : f32
    %6 = vector.broadcast %cst_5 : f32 to vector<32x128xf32>
    %7 = arith.maximumf %5, %6 : vector<32x128xf32>
    %8 = arith.truncf %7 : vector<32x128xf32> to vector<32x128xbf16>
    %c0_6 = arith.constant 0 : index
    %c0_7 = arith.constant 0 : index
    %9 = vector.load %arg4[%c0_6, %c0_7] : memref<32x32xbf16, #tpu.memory_space<vmem>>, vector<32x32xbf16>
    %cst_8 = arith.constant dense<0.000000e+00> : vector<32x128xf32>
    %10 = tpu.matmul %9, %8, %cst_8 {dimension_numbers = #tpu.dot_dimension_numbers<[1], [0], [0], [1], [0, 0, 1, 1], [], []>} : vector<32x32xbf16>, vector<32x128xbf16>, vector<32x128xf32> -> vector<32x128xf32>
    %c0_9 = arith.constant 0 : index
    %c0_10 = arith.constant 0 : index
    %11 = vector.load %arg5[%c0_9, %c0_10] : memref<32x1xf32, #tpu.memory_space<vmem>>, vector<32x1xf32>
    %12 = vector.broadcast %11 : vector<32x1xf32> to vector<32x128xf32>
    %13 = arith.addf %10, %12 : vector<32x128xf32>
    %cst_11 = arith.constant 0.000000e+00 : f32
    %14 = vector.broadcast %cst_11 : f32 to vector<32x128xf32>
    %15 = arith.maximumf %13, %14 : vector<32x128xf32>
    %16 = arith.truncf %15 : vector<32x128xf32> to vector<32x128xbf16>
    %17 = arith.extf %16 : vector<32x128xbf16> to vector<32x128xf32>
    %c0_12 = arith.constant 0 : index
    %c0_13 = arith.constant 0 : index
    %18 = vector.load %arg6[%c0_12, %c0_13] : memref<32x1xf32, #tpu.memory_space<vmem>>, vector<32x1xf32>
    %19 = vector.broadcast %18 : vector<32x1xf32> to vector<32x128xf32>
    %20 = arith.mulf %17, %19 : vector<32x128xf32>
    %cst_14 = arith.constant dense<0.000000e+00> : vector<128xf32>
    %21 = vector.multi_reduction <add>, %20, %cst_14 [0] : vector<32x128xf32> to vector<128xf32>
    %22 = vector.shape_cast %21 : vector<128xf32> to vector<1x128xf32>
    %c0_15 = arith.constant 0 : index
    %c0_16 = arith.constant 0 : index
    %23 = vector.load %arg7[%c0_15, %c0_16] : memref<1x1xf32, #tpu.memory_space<vmem>>, vector<1x1xf32>
    %24 = vector.broadcast %23 : vector<1x1xf32> to vector<1x128xf32>
    %25 = arith.addf %22, %24 : vector<1x128xf32>
    %26 = arith.negf %25 : vector<1x128xf32>
    %27 = math.exp %26 : vector<1x128xf32>
    %cst_17 = arith.constant 1.000000e+00 : f32
    %28 = vector.broadcast %cst_17 : f32 to vector<1x128xf32>
    %29 = arith.addf %28, %27 : vector<1x128xf32>
    %30 = arith.divf %28, %29 : vector<1x128xf32>
    %c0_18 = arith.constant 0 : index
    %c0_19 = arith.constant 0 : index
    %31 = vector.load %arg8[%c0_18, %c0_19] : memref<1x128xf32, #tpu.memory_space<vmem>>, vector<1x128xf32>
    tpu.vector_store %arg8[%c0_18, %c0_19], %30 {strides = array<i32>} : memref<1x128xf32, #tpu.memory_space<vmem>>, vector<1x128xf32>,
    return
  }
  func.func @transform_0(%arg0: i32) -> (i32, i32) {
    %c0_i32 = arith.constant 0 : i32
    %c0_i32_0 = arith.constant 0 : i32
    return %c0_i32, %arg0 : i32, i32
  }
  func.func @transform_1(%arg0: i32) -> (i32, i32) {
    %c0_i32 = arith.constant 0 : i32
    %c0_i32_0 = arith.constant 0 : i32
    %c0_i32_1 = arith.constant 0 : i32
    return %c0_i32, %c0_i32_0 : i32, i32
  }
  func.func @transform_2(%arg0: i32) -> (i32, i32) {
    %c0_i32 = arith.constant 0 : i32
    %c0_i32_0 = arith.constant 0 : i32
    %c0_i32_1 = arith.constant 0 : i32
    return %c0_i32, %c0_i32_0 : i32, i32
  }
  func.func @transform_3(%arg0: i32) -> (i32, i32) {
    %c0_i32 = arith.constant 0 : i32
    %c0_i32_0 = arith.constant 0 : i32
    %c0_i32_1 = arith.constant 0 : i32
    return %c0_i32, %c0_i32_0 : i32, i32
  }
  func.func @transform_4(%arg0: i32) -> (i32, i32) {
    %c0_i32 = arith.constant 0 : i32
    %c0_i32_0 = arith.constant 0 : i32
    %c0_i32_1 = arith.constant 0 : i32
    return %c0_i32, %c0_i32_0 : i32, i32
  }
  func.func @transform_5(%arg0: i32) -> (i32, i32) {
    %c0_i32 = arith.constant 0 : i32
    %c0_i32_0 = arith.constant 0 : i32
    %c0_i32_1 = arith.constant 0 : i32
    return %c0_i32, %c0_i32_0 : i32, i32
  }
  func.func @transform_6(%arg0: i32) -> (i32, i32) {
    %c0_i32 = arith.constant 0 : i32
    %c0_i32_0 = arith.constant 0 : i32
    %c0_i32_1 = arith.constant 0 : i32
    return %c0_i32, %c0_i32_0 : i32, i32
  }
  func.func @transform_7(%arg0: i32) -> (i32, i32) {
    %c0_i32 = arith.constant 0 : i32
    %c0_i32_0 = arith.constant 0 : i32
    return %c0_i32, %arg0 : i32, i32
  }
}

</mosaic_0001>

<bundles_post_ra>
// kernel: tpu_custom_call.1
= control target key start
LH: loop header
LB: loop body
LE: loop exit
PB: predicated region body
PF: predicated region fallthrough
CT: control target
= control target key end

     0   :  { %s485_s0 = inlined_call_operand.vmem [shape: bf16[4,128], index: 0, kind: input, shape index: {}]   ;;  %s486_s1 = inlined_call_operand.vmem [shape: bf16[32,4], index: 1, kind: input, shape index: {}]   ;;  %s487_s2 = inlined_call_operand.vmem [shape: f32[32,1], index: 2, kind: input, shape index: {}]   ;;  %s488_s3 = inlined_call_operand.vmem [shape: bf16[32,32], index: 3, kind: input, shape index: {}]   ;;  %s489_s4 = inlined_call_operand.vmem [shape: f32[32,1], index: 4, kind: input, shape index: {}]   ;;  %s490_s5 = inlined_call_operand.vmem [shape: f32[32,1], index: 5, kind: input, shape index: {}]   ;;  %s491_s6 = inlined_call_operand.<no memory space> [shape: f32[1,1], index: 6, kind: input, shape index: {}]   ;;  %s492_s7 = inlined_call_operand.hbm [shape: f32[1,128], index: 7, kind: output, shape index: {}]  }
   0x1   :  { %v12_v0 = vstv %s491_s6 }
   0x2   :  { %13 = vst [vmem:[#allocation2] sm:$0x1] %v12_v0 }
   0x3   :  { %v30_v1 = vld [vmem:[%s485_s0] sm:$0x3]  ;;  %vm76_vm0 = vcmask 1041408   ;;  %vm69_vm1 = vcmask 31744   ;;  %v344_v4 = vld [vmem:[%s486_s1 + $0x8] sm:$0xff]   ;;  %v375_v6 = vmov 0  }
   0x4   :  { %v343_v2 = vld [vmem:[%s486_s1] sm:$0xff]   ;;  %338 = vmatprep.subr.msk.bf16.mxu0 %vm76_vm0, %v30_v1  ;;  %v78_v3 = vsel %vm76_vm0, %v30_v1, 0  ;;  %341 = vset.pattern.permute.xlu0 %v375_v6  ;;  %v37_v7 = vld [vmem:[%s487_s2 + $0x10] sm:$0xff]  ;;  %v36_v8 = vld [vmem:[%s487_s2 + $0x8] sm:$0xff] }
   0x5   :  { %325 = vmatpush3.bf16.msra.mxu0 %v78_v3  ;;  %326 = vmatprep.mubr.msk.bf16.mxu0 %vm69_vm1, %v343_v2  ;;  %v35_v5 = vld [vmem:[%s487_s2] sm:$0xff]  ;;  %v38_v9 = vld [vmem:[%s487_s2 + $0x18] sm:$0xff] }
   0x6   :  { %342 = vset.pattern.permute.xlu1 %v375_v6  ;;  %41 = vperm.xlu0 %341, %v35_v5  }
   0x7   :  { %51 = vperm.xlu1 %342, %v37_v7  }
   0x8   :  { %327 = vmatmul.mubr.msk.bf16.vlgmr.msra.gmra.mrb[0].mxu0 %vm69_vm1, %v344_v4 }
   0xa   :  { %46 = vperm.xlu0 %341, %v36_v8  }
   0xb   :  { %56 = vperm.xlu1 %342, %v38_v9  }
   0xc   :  { %14 = vsyncpa [#allocation4], 0  ;;  %v139_v10 = vld [vmem:[%s489_s4] sm:$0xff]  ;;  %v140_v11 = vld [vmem:[%s489_s4 + $0x8] sm:$0xff]  ;;  %vm173_vm2 = vcmask 261120   ;;  %v282_v7 = vlaneseq }
   0xd   :  { %v141_v12 = vld [vmem:[%s489_s4 + $0x10] sm:$0xff]  ;;  %v142_v13 = vld [vmem:[%s489_s4 + $0x18] sm:$0xff]  ;;  %v239_v14 = vld [vmem:[%s490_s5] sm:$0xff] }
   0xe   :  { %145 = vperm.xlu0 %341, %v139_v10   ;;  %v240_v15 = vld [vmem:[%s490_s5 + $0x8] sm:$0xff]  ;;  %v241_v16 = vld [vmem:[%s490_s5 + $0x10] sm:$0xff]  ;;  %v242_v17 = vld [vmem:[%s490_s5 + $0x18] sm:$0xff]  ;;  %v283_v10 = vshrl.u32 %v282_v7, 7 }
   0xf   :  { %150 = vperm.xlu1 %342, %v140_v11   ;;  %v276_v18 = vld [vmem:[#allocation2] sm:$0x1]  ;;  %v346_v38 = vld [vmem:[%s488_s3 + $0x8] sm:$0xff]  }
  0x10   :  { %v345_v19 = vld [vmem:[%s488_s3] sm:$0xff]   ;;  %s376_s3 = smov [#allocation3]  }
  0x11   :  { %334 = vmatprep.mubr.msk.bf16.mxu1 %vm173_vm2, %v345_v19  ;;  %s300_s8 = sshll.u32 %s376_s3, 4  ;;  %s301_s8 = int_to_ptr.vmem [resolvable:$true] %s300_s8 }
  0x12   :  { %155 = vperm.xlu0 %341, %v141_v12   ;;  %s351_s6 = scalar_lea.vmem %s301_s8, 16  ;;  %s355_s9 = scalar_lea.vmem %s301_s8, 32 }
  0x13   :  { %160 = vperm.xlu1 %342, %v142_v13   ;;  %v284_v13 = vsub.s32 0, %v283_v10  ;;  %p352_p0 = scmp.ne.s32.totalorder %s301_s8, %s351_s6  ;;  %p356_p1 = scmp.lt.s32.totalorder %s301_s8, %s301_s8 }
  0x14   :  { %p357_p2 = scmp.lt.s32.totalorder %s355_s9, %s351_s6 }
  0x16   :  { %245 = vperm.xlu0 %341, %v239_v14   ;;  %p358_p3 = por %p357_p2, %p356_p1 }
  0x17   :  { %250 = vperm.xlu1 %342, %v240_v15  }
  0x18   :  { %p359_p4 = pnand %p358_p3, %p352_p0 }
  0x1a   :  { %255 = vperm.xlu0 %341, %v241_v16  }
  0x1b   :  { %260 = vperm.xlu1 %342, %v242_v17  }
  0x1e   :  { %279 = vperm.xlu0 %341, %v276_v18  }
  0x85   :  { %v42_v21 = vpop.permute.xlu0 %41 }
  0x86   :  { %v52_v20 = vpop.permute.xlu1 %51 }
  0x89   :  { %v47_v28 = vpop.permute.xlu0 %46 }
  0x8a   :  { %v57_v25 = vpop.permute.xlu1 %56 }
  0x8d   :  { %v146_v39 = vpop.permute.xlu0 %145 }
  0x8e   :  { %v151_v40 = vpop.permute.xlu1 %150 }
  0x91   :  { %v156_v41 = vpop.permute.xlu0 %155 }
  0x92   :  { %v161_v45 = vpop.permute.xlu1 %160 }
  0x95   :  { %v246_v55 = vpop.permute.xlu0 %245 }
  0x96   :  { %v251_v58 = vpop.permute.xlu1 %250 }
  0x99   :  { %v256_v1 = vpop.permute.xlu0 %255 }
  0x9a   :  { %v261_v4 = vpop.permute.xlu1 %260 }
  0x9d   :  { %v280_v15 = vpop.permute.xlu0 %279 }
  0x9e   :  { %v285_v17 = vrot.slane %v280_v15, %v284_v13 }
  0xdb   :  { %v328_v22 = vpop.f32.mrb[0].mxu0 }
  0xdc   :  { %v123_v23 = vadd.f32 %v328_v22, %v52_v20  ;;  %v114_v24 = vpop.f32.mrb[1].mxu0 }
  0xdd   :  { %v115_v26 = vadd.f32 %v114_v24, %v42_v21  ;;  %v329_v27 = vpop.f32.mrb[2].mxu0 }
  0xde   :  { %v126_v29 = vadd.f32 %v329_v27, %v57_v25  ;;  %v117_v30 = vpop.f32.mrb[3].mxu0  ;;  %v131_v32 = vmax.f32 %v123_v23, 0.0 }
  0xdf   :  { %v118_v31 = vadd.f32 %v117_v30, %v47_v28  ;;  %v129_v34 = vmax.f32 %v115_v26, 0.0 }
  0xe0   :  { %v132_v33 = vmax.f32 %v126_v29, 0.0 }
  0xe1   :  { %v130_v35 = vmax.f32 %v118_v31, 0.0 }
  0xe2   :  { %v134_v36 = vpack.c.bf16 %v132_v33, %v131_v32 }
  0xe3   :  { %v133_v37 = vpack.c.bf16 %v130_v35, %v129_v34 }
  0xe5   :  { %330 = vmatprep.subr.bf16.mxu1 %v133_v37 }
  0xe6   :  { %331 = vmatpush3.bf16.msra.mxu1 %v133_v37 }
  0xe7   :  { %332 = vmatprep.subr.bf16.mxu1 %v134_v36 }
  0xea   :  { %333 = vmatpush3.bf16.msra.mxu1 %v134_v36 }
  0xed   :  { %335 = vmatmul.mubr.msk.bf16.vlgmr.msra.gmra.mrb[0].mxu1 %vm173_vm2, %v346_v38 }
 0x1c0   :  { %v336_v42 = vpop.f32.mrb[0].mxu1 }
 0x1c1   :  { %v223_v43 = vadd.f32 %v336_v42, %v156_v41  ;;  %v214_v44 = vpop.f32.mrb[1].mxu1 }
 0x1c2   :  { %v215_v46 = vadd.f32 %v214_v44, %v146_v39  ;;  %v337_v47 = vpop.f32.mrb[2].mxu1 }
 0x1c3   :  { %v226_v48 = vadd.f32 %v337_v47, %v161_v45  ;;  %v217_v49 = vpop.f32.mrb[3].mxu1  ;;  %v231_v51 = vmax.f32 %v223_v43, 0.0 }
 0x1c4   :  { %v218_v50 = vadd.f32 %v217_v49, %v151_v40  ;;  %v229_v53 = vmax.f32 %v215_v46, 0.0 }
 0x1c5   :  { %v232_v52 = vmax.f32 %v226_v48, 0.0 }
 0x1c6   :  { %v230_v54 = vmax.f32 %v218_v50, 0.0 }
 0x1c7   :  { %v234_v56 = vpack.c.bf16 %v232_v52, %v231_v51 }
 0x1c8   :  { %v233_v57 = vpack.c.bf16 %v230_v54, %v229_v53 }
 0x1c9   :  { %v237_v59 = vunpack.c.l.bf16 %v234_v56  ;;  %v238_v62 = vunpack.c.h.bf16 %v234_v56 }
 0x1ca   :  { %v235_v60 = vunpack.c.l.bf16 %v233_v57  ;;  %v236_v61 = vunpack.c.h.bf16 %v233_v57 }
 0x1cb   :  { %v265_v2 = vmul.f32 %v256_v1, %v237_v59  ;;  %v266_v5 = vmul.f32 %v261_v4, %v238_v62 }
 0x1cc   :  { %v263_v63 = vmul.f32 %v246_v55, %v235_v60  ;;  %v264_v0 = vmul.f32 %v251_v58, %v236_v61 }
 0x1ce   :  { %v267_v3 = vadd.f32 %v264_v0, %v263_v63 }
 0x1d0   :  { %v268_v6 = vadd.f32 %v267_v3, %v265_v2 }
 0x1d2   :  { %v269_v8 = vadd.f32 %v268_v6, %v266_v5 }
 0x1d4   :  { %v270_v9 = vrot.slane %v269_v8, 4 }
 0x1d6   :  { %v271_v11 = vadd.f32 %v270_v9, %v269_v8 }
 0x1d8   :  { %v272_v12 = vrot.slane %v271_v11, 2 }
 0x1da   :  { %v273_v14 = vadd.f32 %v272_v12, %v271_v11 }
 0x1dc   :  { %v274_v16 = vrot.slane %v273_v14, 1 }
 0x1de   :  { %v275_v18 = vadd.f32 %v274_v16, %v273_v14 }
 0x1e0   :  { %v286_v19 = vadd.f32 %v285_v17, %v275_v18 }
 0x1e2   :  { %v316_v20 = vmul.f32 -1.442695, %v286_v19 }
 0x1e4   :  { %347 = vpow2.f32 %v316_v20 }
 0x1ee   :  { %v348_v21 = vpop.eup %347 }
 0x1ef   :  { %v290_v22 = vadd.f32 1.0, %v348_v21 }
 0x1f1   :  { %349 = vrcp.f32 %v290_v22 }
 0x1fb   :  { %v350_v23 = vpop.eup %349 }
 0x1fc   :  { %293 = vst [vmem:[#allocation3] sm:$0x1] %v350_v23 }
 0x1fd   :  { %362 = shalt.err (!%p359_p4)
}
 0x1fe   :  { %s363_s11 = scalar_lea.hbm %s492_s7, 16 }
 0x1ff   :  { %p364_p5 = scmp.ne.s32.totalorder %s492_s7, %s363_s11  ;;  %p367_p6 = scmp.lt.u32.totalorder %s363_s11, %s492_s7 }
 0x201   :  { %p369_p7 = pnand %p367_p6, %p364_p5 }
 0x203   :  { %372 = shalt.err (!%p369_p7)
}
 0x204   :  { %303 = dma.vmem_to_hbm [thread:$0]  %s301_s8, 16, %s492_s7, [#allocation4]  }
 0x205   :  { %373 = dma.done.wait [#allocation4], 16  }
 0x206   :  { %374 = vsyncadd [#allocation4], 4294967280 }
 0x207   :  { %307 = vsyncpa [#allocation4], 1 }

</bundles_post_ra>
